<compile_context>
chip_gen: v7x
topology: tpu7x:2x2x1
jax: 0.10.0
libtpu: 0.0.40
codegen_flags: <defaults>
</compile_context>

<pallas_src>
import jax
import jax.numpy as jnp
from jax.experimental import pallas as pl
from jax.experimental.pallas import tpu as pltpu

IN_DIM = 32 * 32 * 3   # 3072
HID = 100
OUT_DIM = 10


def mlp_kernel(x_ref, w1_ref, b1_ref, w2_ref, b2_ref, o_ref):
    # One batch tile per grid step; weights use the same block every step, so
    # they stay VMEM-resident and are only DMA'd once.
    x = x_ref[...]                                             # (TM, 3072) bf16
    h = jnp.dot(x, w1_ref[...], preferred_element_type=jnp.float32)
    h = h + b1_ref[...]                                        # f32 bias broadcast
    h = jnp.maximum(h, 0.0)                                    # ReLU
    y = jnp.dot(h.astype(w2_ref.dtype), w2_ref[...],
                preferred_element_type=jnp.float32)
    y = y + b2_ref[...]
    o_ref[...] = y.astype(o_ref.dtype)


def _round_up(n, m):
    return ((n + m - 1) // m) * m


def simple_nn_forward(x_nchw, w1, b1, w2, b2, *, tm=512):
    """x_nchw: (B, 3, 32, 32) float32. Returns logits (B, 10) float32."""
    B = x_nchw.shape[0]
    x = x_nchw.reshape(B, IN_DIM).astype(jnp.bfloat16)

    # Batch tile: multiple of 8 sublanes, at most `tm`; pad B up to a tile multiple.
    tm_eff = min(tm, _round_up(B, 8))
    Bp = _round_up(B, tm_eff)
    if Bp != B:
        x = jnp.pad(x, ((0, Bp - B), (0, 0)))

    w1b = w1.astype(jnp.bfloat16)
    w2b = w2.astype(jnp.bfloat16)
    b1f = b1.astype(jnp.float32).reshape(1, HID)
    b2f = b2.astype(jnp.float32).reshape(1, OUT_DIM)

    grid = (Bp // tm_eff,)
    flops = 2 * Bp * (IN_DIM * HID + HID * OUT_DIM)
    bytes_accessed = (x.size * 2 + w1b.size * 2 + w2b.size * 2
                      + b1f.size * 4 + b2f.size * 4 + Bp * OUT_DIM * 4)

    out = pl.pallas_call(
        mlp_kernel,
        out_shape=jax.ShapeDtypeStruct((Bp, OUT_DIM), jnp.float32),
        grid_spec=pltpu.PrefetchScalarGridSpec(
            num_scalar_prefetch=0,
            grid=grid,
            in_specs=[
                pl.BlockSpec((tm_eff, IN_DIM), lambda i: (i, 0)),   # x tile per step
                pl.BlockSpec((IN_DIM, HID), lambda i: (0, 0)),      # W1 resident
                pl.BlockSpec((1, HID), lambda i: (0, 0)),           # b1 resident
                pl.BlockSpec((HID, OUT_DIM), lambda i: (0, 0)),     # W2 resident
                pl.BlockSpec((1, OUT_DIM), lambda i: (0, 0)),       # b2 resident
            ],
            out_specs=pl.BlockSpec((tm_eff, OUT_DIM), lambda i: (i, 0)),
        ),
        compiler_params=pltpu.CompilerParams(
            # Independent batch tiles -> parallel axis (v7x: 2 TCs per chip).
            dimension_semantics=("parallel",),
            # Raise v5e's 16 MiB scoped default; <= physical VMEM on all chips.
            vmem_limit_bytes=32 * 1024 * 1024,
        ),
        cost_estimate=pl.CostEstimate(
            flops=flops, bytes_accessed=bytes_accessed, transcendentals=0),
    )(x, w1b, b1f, w2b, b2f)
    return out[:B]


def init_params(key):
    """Deterministic init mimicking nn.Linear's U(-1/sqrt(fan_in), 1/sqrt(fan_in))."""
    k1, k2, k3, k4 = jax.random.split(key, 4)
    lim1 = 1.0 / jnp.sqrt(jnp.float32(IN_DIM))
    lim2 = 1.0 / jnp.sqrt(jnp.float32(HID))
    w1 = jax.random.uniform(k1, (IN_DIM, HID), jnp.float32, -lim1, lim1)
    b1 = jax.random.uniform(k2, (1, HID), jnp.float32, -lim1, lim1)
    w2 = jax.random.uniform(k3, (HID, OUT_DIM), jnp.float32, -lim2, lim2)
    b2 = jax.random.uniform(k4, (1, OUT_DIM), jnp.float32, -lim2, lim2)
    return w1, b1, w2, b2


if __name__ == "__main__":
    key = jax.random.PRNGKey(0)
    kx, kp = jax.random.split(key)
    # Small batch; spatial/channel sizes are fixed by the module (32*32*3 input).
    x = jax.random.normal(kx, (2, 3, 32, 32), jnp.float32)   # NCHW like PyTorch
    w1, b1, w2, b2 = init_params(kp)

    logits = simple_nn_forward(x, w1, b1, w2, b2)
    jax.block_until_ready(logits)

    # Reference in plain JAX, mirroring the kernel's bf16-operand / f32-accumulate path.
    xb = x.reshape(2, -1).astype(jnp.bfloat16).astype(jnp.float32)
    w1r = w1.astype(jnp.bfloat16).astype(jnp.float32)
    w2r = w2.astype(jnp.bfloat16).astype(jnp.float32)
    h_ref = jnp.maximum(xb @ w1r + b1, 0.0).astype(jnp.bfloat16).astype(jnp.float32)
    ref = h_ref @ w2r + b2
    assert logits.shape == (2, 10)
    assert jnp.allclose(logits, ref, atol=2e-2, rtol=2e-2)

    # predict / predict_proba equivalents (glue, outside the kernel)
    _ = jnp.argmax(logits, axis=1)
    _ = jax.nn.softmax(logits, axis=1)

    print("KERNEL_OK")
</pallas_src>

<mosaic_0001>
module attributes {stable_mosaic.version = 11 : i64} {
  func.func @mlp_kernel(%arg0: i32, %arg1: memref<8x3072xbf16, #tpu.memory_space<vmem>>, %arg2: memref<3072x100xbf16, #tpu.memory_space<vmem>>, %arg3: memref<1x100xf32, #tpu.memory_space<vmem>>, %arg4: memref<100x10xbf16, #tpu.memory_space<vmem>>, %arg5: memref<1x10xf32, #tpu.memory_space<vmem>>, %arg6: memref<8x10xf32, #tpu.memory_space<vmem>>) attributes {dimension_semantics = [#tpu.dimension_semantics<parallel>], iteration_bounds = array<i64: 1>, scalar_prefetch = 0 : i64, scratch_operands = 0 : i64, tpu.core_type = #tpu.core_type<tc>, window_params = [{transform_indices = @transform_0, window_bounds = array<i64: 8, 3072>}, {pipeline_mode = #tpu.pipeline_mode<synchronous>, transform_indices = @transform_1, window_bounds = array<i64: 3072, 100>}, {pipeline_mode = #tpu.pipeline_mode<synchronous>, transform_indices = @transform_2, window_bounds = array<i64: 1, 100>}, {pipeline_mode = #tpu.pipeline_mode<synchronous>, transform_indices = @transform_3, window_bounds = array<i64: 100, 10>}, {pipeline_mode = #tpu.pipeline_mode<synchronous>, transform_indices = @transform_4, window_bounds = array<i64: 1, 10>}, {transform_indices = @transform_5, window_bounds = array<i64: 8, 10>}]} {
    %c0 = arith.constant 0 : index
    %c0_0 = arith.constant 0 : index
    %0 = vector.load %arg1[%c0, %c0_0] : memref<8x3072xbf16, #tpu.memory_space<vmem>>, vector<8x3072xbf16>
    %c0_1 = arith.constant 0 : index
    %c0_2 = arith.constant 0 : index
    %1 = vector.load %arg2[%c0_1, %c0_2] : memref<3072x100xbf16, #tpu.memory_space<vmem>>, vector<3072x100xbf16>
    %cst = arith.constant dense<0.000000e+00> : vector<8x100xf32>
    %2 = tpu.matmul %0, %1, %cst {dimension_numbers = #tpu.dot_dimension_numbers<[1], [0], [0], [1], [0, 0, 1, 1], [], []>} : vector<8x3072xbf16>, vector<3072x100xbf16>, vector<8x100xf32> -> vector<8x100xf32>
    %c0_3 = arith.constant 0 : index
    %c0_4 = arith.constant 0 : index
    %3 = vector.load %arg3[%c0_3, %c0_4] : memref<1x100xf32, #tpu.memory_space<vmem>>, vector<1x100xf32>
    %4 = vector.broadcast %3 : vector<1x100xf32> to vector<8x100xf32>
    %5 = arith.addf %2, %4 : vector<8x100xf32>
    %cst_5 = arith.constant 0.000000e+00 : f32
    %6 = vector.broadcast %cst_5 : f32 to vector<8x100xf32>
    %7 = arith.maximumf %5, %6 : vector<8x100xf32>
    %8 = arith.truncf %7 : vector<8x100xf32> to vector<8x100xbf16>
    %c0_6 = arith.constant 0 : index
    %c0_7 = arith.constant 0 : index
    %9 = vector.load %arg4[%c0_6, %c0_7] : memref<100x10xbf16, #tpu.memory_space<vmem>>, vector<100x10xbf16>
    %cst_8 = arith.constant dense<0.000000e+00> : vector<8x10xf32>
    %10 = tpu.matmul %8, %9, %cst_8 {dimension_numbers = #tpu.dot_dimension_numbers<[1], [0], [0], [1], [0, 0, 1, 1], [], []>} : vector<8x100xbf16>, vector<100x10xbf16>, vector<8x10xf32> -> vector<8x10xf32>
    %c0_9 = arith.constant 0 : index
    %c0_10 = arith.constant 0 : index
    %11 = vector.load %arg5[%c0_9, %c0_10] : memref<1x10xf32, #tpu.memory_space<vmem>>, vector<1x10xf32>
    %12 = vector.broadcast %11 : vector<1x10xf32> to vector<8x10xf32>
    %13 = arith.addf %10, %12 : vector<8x10xf32>
    %c0_11 = arith.constant 0 : index
    %c0_12 = arith.constant 0 : index
    %14 = vector.load %arg6[%c0_11, %c0_12] : memref<8x10xf32, #tpu.memory_space<vmem>>, vector<8x10xf32>
    tpu.vector_store %arg6[%c0_11, %c0_12], %13 {strides = array<i32>} : memref<8x10xf32, #tpu.memory_space<vmem>>, vector<8x10xf32>,
    return
  }
  func.func @transform_0(%arg0: i32) -> (i32, i32) {
    %c0_i32 = arith.constant 0 : i32
    %c0_i32_0 = arith.constant 0 : i32
    return %arg0, %c0_i32 : i32, i32
  }
  func.func @transform_1(%arg0: i32) -> (i32, i32) {
    %c0_i32 = arith.constant 0 : i32
    %c0_i32_0 = arith.constant 0 : i32
    %c0_i32_1 = arith.constant 0 : i32
    return %c0_i32, %c0_i32_0 : i32, i32
  }
  func.func @transform_2(%arg0: i32) -> (i32, i32) {
    %c0_i32 = arith.constant 0 : i32
    %c0_i32_0 = arith.constant 0 : i32
    %c0_i32_1 = arith.constant 0 : i32
    return %c0_i32, %c0_i32_0 : i32, i32
  }
  func.func @transform_3(%arg0: i32) -> (i32, i32) {
    %c0_i32 = arith.constant 0 : i32
    %c0_i32_0 = arith.constant 0 : i32
    %c0_i32_1 = arith.constant 0 : i32
    return %c0_i32, %c0_i32_0 : i32, i32
  }
  func.func @transform_4(%arg0: i32) -> (i32, i32) {
    %c0_i32 = arith.constant 0 : i32
    %c0_i32_0 = arith.constant 0 : i32
    %c0_i32_1 = arith.constant 0 : i32
    return %c0_i32, %c0_i32_0 : i32, i32
  }
  func.func @transform_5(%arg0: i32) -> (i32, i32) {
    %c0_i32 = arith.constant 0 : i32
    %c0_i32_0 = arith.constant 0 : i32
    return %arg0, %c0_i32 : i32, i32
  }
}

</mosaic_0001>

<bundles_post_ra>
// kernel: tpu_custom_call.1
= control target key start
LH: loop header
LB: loop body
LE: loop exit
PB: predicated region body
PF: predicated region fallthrough
CT: control target
= control target key end

     0   :  { %s3716_s0 = inlined_call_operand.vmem [shape: bf16[8,3072], index: 0, kind: input, shape index: {}]   ;;  %s3717_s1 = inlined_call_operand.vmem [shape: bf16[3072,100], index: 1, kind: input, shape index: {}]   ;;  %s3718_s2 = inlined_call_operand.vmem [shape: f32[1,100], index: 2, kind: input, shape index: {}]   ;;  %s3719_s3 = inlined_call_operand.vmem [shape: bf16[100,10], index: 3, kind: input, shape index: {}]   ;;  %s3720_s4 = inlined_call_operand.vmem [shape: f32[1,10], index: 4, kind: input, shape index: {}]   ;;  %s3721_s5 = inlined_call_operand.hbm [shape: f32[8,10], index: 5, kind: output, shape index: {}]  }
   0x1   :  { %v2785_v0 = vld [vmem:[%s3717_s1 + $0x40] sm:$0xff]   ;;  %v2789_v4 = vld [vmem:[%s3717_s1 + $0x48] sm:$0xff]   ;;  %v2793_v8 = vld [vmem:[%s3717_s1 + $0x50] sm:$0xff]  }
   0x2   :  { %v2786_v1 = vld [vmem:[%s3717_s1 + $0xc0] sm:$0xff]   ;;  %2492 = vmatprep.subr.bf16.mxu0 %v2785_v0  ;;  %v2790_v5 = vld [vmem:[%s3717_s1 + $0xc8] sm:$0xff]   ;;  %v2794_v9 = vld [vmem:[%s3717_s1 + $0xd0] sm:$0xff]  }
   0x3   :  { %v2787_v2 = vld [vmem:[%s3717_s1] sm:$0xff]   ;;  %2514 = vmatprep.subr.bf16.mxu1 %v2786_v1  ;;  %v2791_v6 = vld [vmem:[%s3717_s1 + $0x8] sm:$0xff]   ;;  %v2795_v10 = vld [vmem:[%s3717_s1 + $0x10] sm:$0xff]  }
   0x4   :  { %v2788_v3 = vld [vmem:[%s3717_s1 + $0x80] sm:$0xff]   ;;  %2493 = vmatpush3.bf16.msra.mxu0 %v2787_v2  ;;  %v2792_v7 = vld [vmem:[%s3717_s1 + $0x88] sm:$0xff]   ;;  %v2796_v11 = vld [vmem:[%s3717_s1 + $0x90] sm:$0xff]  }
   0x5   :  { %2515 = vmatpush3.bf16.msra.mxu1 %v2788_v3  ;;  %2494 = vmatprep.subr.bf16.mxu0 %v2789_v4  ;;  %v2797_v12 = vld [vmem:[%s3717_s1 + $0x58] sm:$0xff]   ;;  %v2801_v16 = vld [vmem:[%s3717_s1 + $0x60] sm:$0xff]   ;;  %v2805_v20 = vld [vmem:[%s3717_s1 + $0x68] sm:$0xff]  }
   0x6   :  { %2516 = vmatprep.subr.bf16.mxu1 %v2790_v5  ;;  %v2798_v13 = vld [vmem:[%s3717_s1 + $0xd8] sm:$0xff]   ;;  %v2802_v17 = vld [vmem:[%s3717_s1 + $0xe0] sm:$0xff]   ;;  %v2806_v21 = vld [vmem:[%s3717_s1 + $0xe8] sm:$0xff]  }
   0x7   :  { %v2799_v14 = vld [vmem:[%s3717_s1 + $0x18] sm:$0xff]   ;;  %v2803_v18 = vld [vmem:[%s3717_s1 + $0x20] sm:$0xff]   ;;  %v2807_v22 = vld [vmem:[%s3717_s1 + $0x28] sm:$0xff]  }
   0x8   :  { %2495 = vmatpush3.bf16.msra.mxu0 %v2791_v6  ;;  %v2800_v15 = vld [vmem:[%s3717_s1 + $0x98] sm:$0xff]   ;;  %v2804_v19 = vld [vmem:[%s3717_s1 + $0xa0] sm:$0xff]   ;;  %v2808_v23 = vld [vmem:[%s3717_s1 + $0xa8] sm:$0xff]  }
   0x9   :  { %2517 = vmatpush3.bf16.msra.mxu1 %v2792_v7  ;;  %2496 = vmatprep.subr.bf16.mxu0 %v2793_v8  ;;  %v2809_v24 = vld [vmem:[%s3717_s1 + $0x70] sm:$0xff]   ;;  %v2813_v28 = vld [vmem:[%s3717_s1 + $0x78] sm:$0xff]   ;;  %v22_v32 = vld [vmem:[%s3716_s0] sm:$0xff] }
   0xa   :  { %2518 = vmatprep.subr.bf16.mxu1 %v2794_v9  ;;  %v2810_v25 = vld [vmem:[%s3717_s1 + $0xf0] sm:$0xff]   ;;  %v2814_v29 = vld [vmem:[%s3717_s1 + $0xf8] sm:$0xff]   ;;  %v23_v33 = vld [vmem:[%s3716_s0 + $0x8] sm:$0xff]  ;;  %v2267_v34 = vcombine.low %v22_v32, %v22_v32  ;;  %v2268_v35 = vcombine.high %v22_v32, %v22_v32 }
   0xb   :  { %v2811_v26 = vld [vmem:[%s3717_s1 + $0x30] sm:$0xff]   ;;  %v2815_v30 = vld [vmem:[%s3717_s1 + $0x38] sm:$0xff]   ;;  %v2269_v36 = vcombine.low %v23_v33, %v23_v33  ;;  %v2270_v37 = vcombine.high %v23_v33, %v23_v33  ;;  %v2821_v38 = vld [vmem:[%s3717_s1 + $0x140] sm:$0xff]  }
   0xc   :  { %2497 = vmatpush3.bf16.msra.mxu0 %v2795_v10  ;;  %v2812_v27 = vld [vmem:[%s3717_s1 + $0xb0] sm:$0xff]   ;;  %v2816_v31 = vld [vmem:[%s3717_s1 + $0xb8] sm:$0xff]   ;;  %v2822_v39 = vld [vmem:[%s3717_s1 + $0x1c0] sm:$0xff]   ;;  %1693 = vmatprep.mubr.bf16.mxu0 %v2268_v35 }
   0xd   :  { %2519 = vmatpush3.bf16.msra.mxu1 %v2796_v11  ;;  %2498 = vmatprep.subr.bf16.mxu0 %v2797_v12  ;;  %v2823_v40 = vld [vmem:[%s3717_s1 + $0x100] sm:$0xff]   ;;  %v2825_v42 = vld [vmem:[%s3717_s1 + $0x148] sm:$0xff]   ;;  %v2829_v46 = vld [vmem:[%s3717_s1 + $0x150] sm:$0xff]  }
   0xe   :  { %2520 = vmatprep.subr.bf16.mxu1 %v2798_v13  ;;  %1733 = vmatprep.mubr.bf16.mxu1 %v2270_v37  ;;  %v2824_v41 = vld [vmem:[%s3717_s1 + $0x180] sm:$0xff]   ;;  %v2826_v43 = vld [vmem:[%s3717_s1 + $0x1c8] sm:$0xff]   ;;  %v2830_v47 = vld [vmem:[%s3717_s1 + $0x1d0] sm:$0xff]  }
   0xf   :  { %v2827_v44 = vld [vmem:[%s3717_s1 + $0x108] sm:$0xff]   ;;  %v2831_v48 = vld [vmem:[%s3717_s1 + $0x110] sm:$0xff]   ;;  %v2833_v50 = vld [vmem:[%s3717_s1 + $0x158] sm:$0xff]  }
  0x10   :  { %2499 = vmatpush3.bf16.msra.mxu0 %v2799_v14  ;;  %v2828_v45 = vld [vmem:[%s3717_s1 + $0x188] sm:$0xff]   ;;  %v2832_v49 = vld [vmem:[%s3717_s1 + $0x190] sm:$0xff]   ;;  %v2834_v51 = vld [vmem:[%s3717_s1 + $0x1d8] sm:$0xff]  }
  0x11   :  { %2521 = vmatpush3.bf16.msra.mxu1 %v2800_v15  ;;  %2500 = vmatprep.subr.bf16.mxu0 %v2801_v16  ;;  %v2835_v52 = vld [vmem:[%s3717_s1 + $0x118] sm:$0xff]   ;;  %v2837_v54 = vld [vmem:[%s3717_s1 + $0x160] sm:$0xff]   ;;  %v2841_v58 = vld [vmem:[%s3717_s1 + $0x168] sm:$0xff]  }
  0x12   :  { %2522 = vmatprep.subr.bf16.mxu1 %v2802_v17  ;;  %v2836_v53 = vld [vmem:[%s3717_s1 + $0x198] sm:$0xff]   ;;  %v2838_v55 = vld [vmem:[%s3717_s1 + $0x1e0] sm:$0xff]   ;;  %v2842_v59 = vld [vmem:[%s3717_s1 + $0x1e8] sm:$0xff]  }
  0x13   :  { %v2839_v56 = vld [vmem:[%s3717_s1 + $0x120] sm:$0xff]   ;;  %v2843_v60 = vld [vmem:[%s3717_s1 + $0x128] sm:$0xff]   ;;  %v2845_v62 = vld [vmem:[%s3717_s1 + $0x170] sm:$0xff]  }
  0x14   :  { %2501 = vmatpush3.bf16.msra.mxu0 %v2803_v18  ;;  %v2840_v57 = vld [vmem:[%s3717_s1 + $0x1a0] sm:$0xff]   ;;  %v2844_v61 = vld [vmem:[%s3717_s1 + $0x1a8] sm:$0xff]   ;;  %v2846_v63 = vld [vmem:[%s3717_s1 + $0x1f0] sm:$0xff]  }
  0x15   :  { %2523 = vmatpush3.bf16.msra.mxu1 %v2804_v19  ;;  %2502 = vmatprep.subr.bf16.mxu0 %v2805_v20  ;;  %v2847_v0 = vld [vmem:[%s3717_s1 + $0x130] sm:$0xff]   ;;  %v2849_v2 = vld [vmem:[%s3717_s1 + $0x178] sm:$0xff]   ;;  %v2857_v12 = vld [vmem:[%s3717_s1 + $0x240] sm:$0xff]  }
  0x16   :  { %2524 = vmatprep.subr.bf16.mxu1 %v2806_v21  ;;  %v2848_v1 = vld [vmem:[%s3717_s1 + $0x1b0] sm:$0xff]   ;;  %v2850_v3 = vld [vmem:[%s3717_s1 + $0x1f8] sm:$0xff]   ;;  %v2858_v13 = vld [vmem:[%s3717_s1 + $0x2c0] sm:$0xff]  }
  0x17   :  { %v2851_v4 = vld [vmem:[%s3717_s1 + $0x138] sm:$0xff]   ;;  %v24_v6 = vld [vmem:[%s3716_s0 + $0x10] sm:$0xff]  ;;  %v2859_v14 = vld [vmem:[%s3717_s1 + $0x200] sm:$0xff]  }
  0x18   :  { %2503 = vmatpush3.bf16.msra.mxu0 %v2807_v22  ;;  %v2852_v5 = vld [vmem:[%s3717_s1 + $0x1b8] sm:$0xff]   ;;  %v2271_v7 = vcombine.low %v24_v6, %v24_v6  ;;  %v2272_v8 = vcombine.high %v24_v6, %v24_v6  ;;  %v2860_v15 = vld [vmem:[%s3717_s1 + $0x280] sm:$0xff]   ;;  %v2861_v16 = vld [vmem:[%s3717_s1 + $0x248] sm:$0xff]  }
  0x19   :  { %2525 = vmatpush3.bf16.msra.mxu1 %v2808_v23  ;;  %2504 = vmatprep.subr.bf16.mxu0 %v2809_v24  ;;  %v25_v9 = vld [vmem:[%s3716_s0 + $0x18] sm:$0xff]  ;;  %v2862_v17 = vld [vmem:[%s3717_s1 + $0x2c8] sm:$0xff]   ;;  %v2865_v20 = vld [vmem:[%s3717_s1 + $0x250] sm:$0xff]  }
  0x1a   :  { %2526 = vmatprep.subr.bf16.mxu1 %v2810_v25  ;;  %v2273_v10 = vcombine.low %v25_v9, %v25_v9  ;;  %v2274_v11 = vcombine.high %v25_v9, %v25_v9  ;;  %v2863_v18 = vld [vmem:[%s3717_s1 + $0x208] sm:$0xff]   ;;  %v2866_v21 = vld [vmem:[%s3717_s1 + $0x2d0] sm:$0xff]   ;;  %v2869_v24 = vld [vmem:[%s3717_s1 + $0x258] sm:$0xff]  }
  0x1b   :  { %v2864_v19 = vld [vmem:[%s3717_s1 + $0x288] sm:$0xff]   ;;  %v2867_v22 = vld [vmem:[%s3717_s1 + $0x210] sm:$0xff]   ;;  %v2870_v25 = vld [vmem:[%s3717_s1 + $0x2d8] sm:$0xff]  }
  0x1c   :  { %2505 = vmatpush3.bf16.msra.mxu0 %v2811_v26  ;;  %v2868_v23 = vld [vmem:[%s3717_s1 + $0x290] sm:$0xff]   ;;  %v2871_v26 = vld [vmem:[%s3717_s1 + $0x218] sm:$0xff]   ;;  %v2877_v32 = vld [vmem:[%s3717_s1 + $0x268] sm:$0xff]  }
  0x1d   :  { %2527 = vmatpush3.bf16.msra.mxu1 %v2812_v27  ;;  %2506 = vmatprep.subr.bf16.mxu0 %v2813_v28  ;;  %v2872_v27 = vld [vmem:[%s3717_s1 + $0x298] sm:$0xff]   ;;  %v2873_v28 = vld [vmem:[%s3717_s1 + $0x260] sm:$0xff]   ;;  %v2878_v33 = vld [vmem:[%s3717_s1 + $0x2e8] sm:$0xff]  }
  0x1e   :  { %2528 = vmatprep.subr.bf16.mxu1 %v2814_v29  ;;  %v2874_v29 = vld [vmem:[%s3717_s1 + $0x2e0] sm:$0xff]   ;;  %v2880_v35 = vld [vmem:[%s3717_s1 + $0x2a8] sm:$0xff]   ;;  %v2882_v37 = vld [vmem:[%s3717_s1 + $0x2f0] sm:$0xff]  }
  0x1f   :  { %v2913_v6 = vld [vmem:[%s3717_s1 + $0x368] sm:$0xff]  }
  0x20   :  { %2507 = vmatpush3.bf16.msra.mxu0 %v2815_v30  ;;  %v2875_v30 = vld [vmem:[%s3717_s1 + $0x220] sm:$0xff]   ;;  %v2916_v9 = vld [vmem:[%s3717_s1 + $0x3a8] sm:$0xff]  }
  0x21   :  { %2529 = vmatpush3.bf16.msra.mxu1 %v2816_v31  ;;  %2536 = vmatprep.subr.bf16.mxu0 %v2821_v38  ;;  %v2876_v31 = vld [vmem:[%s3717_s1 + $0x2a0] sm:$0xff]   ;;  %v2883_v38 = vld [vmem:[%s3717_s1 + $0x230] sm:$0xff]  }
  0x22   :  { %2558 = vmatprep.subr.bf16.mxu1 %v2822_v39  ;;  %v2884_v39 = vld [vmem:[%s3717_s1 + $0x2b0] sm:$0xff]  }
  0x23   :  { %1694 = vmatmul.mubr.bf16.vlgmr.msra.gmra.mrb[0].mxu0 %v2267_v34  ;;  %v2879_v34 = vld [vmem:[%s3717_s1 + $0x228] sm:$0xff]  }
  0x24   :  { %1734 = vmatmul.mubr.bf16.vlgmr.msra.gmra.mrb[0].mxu1 %v2269_v36  ;;  %2537 = vmatpush3.bf16.msra.mxu0 %v2823_v40  ;;  %v2881_v36 = vld [vmem:[%s3717_s1 + $0x270] sm:$0xff]   ;;  %v2885_v40 = vld [vmem:[%s3717_s1 + $0x278] sm:$0xff]  }
  0x25   :  { %2559 = vmatpush3.bf16.msra.mxu1 %v2824_v41  ;;  %2538 = vmatprep.subr.bf16.mxu0 %v2825_v42  ;;  %v2886_v41 = vld [vmem:[%s3717_s1 + $0x2f8] sm:$0xff]  }
  0x26   :  { %2560 = vmatprep.subr.bf16.mxu1 %v2826_v43  ;;  %1773 = vmatprep.mubr.bf16.mxu0 %v2272_v8  ;;  %v2887_v42 = vld [vmem:[%s3717_s1 + $0x238] sm:$0xff]   ;;  %v2915_v8 = vld [vmem:[%s3717_s1 + $0x328] sm:$0xff]  }
  0x27   :  { %1813 = vmatprep.mubr.bf16.mxu1 %v2274_v11  ;;  %v2888_v43 = vld [vmem:[%s3717_s1 + $0x2b8] sm:$0xff]   ;;  %v2918_v11 = vld [vmem:[%s3717_s1 + $0x3f0] sm:$0xff]  }
  0x28   :  { %2539 = vmatpush3.bf16.msra.mxu0 %v2827_v44  ;;  %v26_v44 = vld [vmem:[%s3716_s0 + $0x20] sm:$0xff] }
  0x29   :  { %2561 = vmatpush3.bf16.msra.mxu1 %v2828_v45  ;;  %2540 = vmatprep.subr.bf16.mxu0 %v2829_v46  ;;  %v27_v45 = vld [vmem:[%s3716_s0 + $0x28] sm:$0xff]  ;;  %v2275_v46 = vcombine.low %v26_v44, %v26_v44 }
  0x2a   :  { %2562 = vmatprep.subr.bf16.mxu1 %v2830_v47  ;;  %v2276_v47 = vcombine.high %v26_v44, %v26_v44  ;;  %v2949_v44 = vld [vmem:[%s3717_s1 + $0x468] sm:$0xff]  }
  0x2c   :  { %2541 = vmatpush3.bf16.msra.mxu0 %v2831_v48  ;;  %v2277_v48 = vcombine.low %v27_v45, %v27_v45 }
  0x2d   :  { %2563 = vmatpush3.bf16.msra.mxu1 %v2832_v49  ;;  %2542 = vmatprep.subr.bf16.mxu0 %v2833_v50  ;;  %v2278_v49 = vcombine.high %v27_v45, %v27_v45  ;;  %v2893_v50 = vld [vmem:[%s3717_s1 + $0x340] sm:$0xff]   ;;  %v2950_v45 = vld [vmem:[%s3717_s1 + $0x4e8] sm:$0xff]  }
  0x2e   :  { %2564 = vmatprep.subr.bf16.mxu1 %v2834_v51  ;;  %v2894_v51 = vld [vmem:[%s3717_s1 + $0x3c0] sm:$0xff]  }
  0x30   :  { %2543 = vmatpush3.bf16.msra.mxu0 %v2835_v52  ;;  %v2895_v52 = vld [vmem:[%s3717_s1 + $0x300] sm:$0xff]  }
  0x31   :  { %2565 = vmatpush3.bf16.msra.mxu1 %v2836_v53  ;;  %2544 = vmatprep.subr.bf16.mxu0 %v2837_v54  ;;  %v2896_v53 = vld [vmem:[%s3717_s1 + $0x380] sm:$0xff]   ;;  %v2897_v54 = vld [vmem:[%s3717_s1 + $0x348] sm:$0xff]  }
  0x32   :  { %2566 = vmatprep.subr.bf16.mxu1 %v2838_v55  ;;  %v2898_v55 = vld [vmem:[%s3717_s1 + $0x3c8] sm:$0xff]  }
  0x34   :  { %2545 = vmatpush3.bf16.msra.mxu0 %v2839_v56  ;;  %v2899_v56 = vld [vmem:[%s3717_s1 + $0x308] sm:$0xff]  }
  0x35   :  { %2567 = vmatpush3.bf16.msra.mxu1 %v2840_v57  ;;  %2546 = vmatprep.subr.bf16.mxu0 %v2841_v58  ;;  %v2900_v57 = vld [vmem:[%s3717_s1 + $0x388] sm:$0xff]   ;;  %v2901_v58 = vld [vmem:[%s3717_s1 + $0x350] sm:$0xff]  }
  0x36   :  { %2568 = vmatprep.subr.bf16.mxu1 %v2842_v59  ;;  %v2902_v59 = vld [vmem:[%s3717_s1 + $0x3d0] sm:$0xff]  }
  0x38   :  { %2547 = vmatpush3.bf16.msra.mxu0 %v2843_v60  ;;  %v2903_v60 = vld [vmem:[%s3717_s1 + $0x310] sm:$0xff]  }
  0x39   :  { %2569 = vmatpush3.bf16.msra.mxu1 %v2844_v61  ;;  %2548 = vmatprep.subr.bf16.mxu0 %v2845_v62  ;;  %v2904_v61 = vld [vmem:[%s3717_s1 + $0x390] sm:$0xff]   ;;  %v2905_v62 = vld [vmem:[%s3717_s1 + $0x358] sm:$0xff]  }
  0x3a   :  { %2570 = vmatprep.subr.bf16.mxu1 %v2846_v63  ;;  %v2906_v63 = vld [vmem:[%s3717_s1 + $0x3d8] sm:$0xff]  }
  0x3c   :  { %2549 = vmatpush3.bf16.msra.mxu0 %v2847_v0  ;;  %v2907_v0 = vld [vmem:[%s3717_s1 + $0x318] sm:$0xff]  }
  0x3d   :  { %2571 = vmatpush3.bf16.msra.mxu1 %v2848_v1  ;;  %2550 = vmatprep.subr.bf16.mxu0 %v2849_v2  ;;  %v2908_v1 = vld [vmem:[%s3717_s1 + $0x398] sm:$0xff]   ;;  %v2909_v2 = vld [vmem:[%s3717_s1 + $0x360] sm:$0xff]  }
  0x3e   :  { %2572 = vmatprep.subr.bf16.mxu1 %v2850_v3  ;;  %v2910_v3 = vld [vmem:[%s3717_s1 + $0x3e0] sm:$0xff]  }
  0x40   :  { %2551 = vmatpush3.bf16.msra.mxu0 %v2851_v4  ;;  %v2911_v4 = vld [vmem:[%s3717_s1 + $0x320] sm:$0xff]  }
  0x41   :  { %2573 = vmatpush3.bf16.msra.mxu1 %v2852_v5  ;;  %2580 = vmatprep.subr.bf16.mxu0 %v2857_v12  ;;  %v2912_v5 = vld [vmem:[%s3717_s1 + $0x3a0] sm:$0xff]   ;;  %v2919_v12 = vld [vmem:[%s3717_s1 + $0x330] sm:$0xff]  }
  0x42   :  { %2602 = vmatprep.subr.bf16.mxu1 %v2858_v13  ;;  %v2920_v13 = vld [vmem:[%s3717_s1 + $0x3b0] sm:$0xff]  }
  0x43   :  { %1774 = vmatmul.mubr.bf16.vlgmr.msra.gmra.mrb[4].mxu0 %v2271_v7  ;;  %v2914_v7 = vld [vmem:[%s3717_s1 + $0x3e8] sm:$0xff]  }
  0x44   :  { %1814 = vmatmul.mubr.bf16.vlgmr.msra.gmra.mrb[4].mxu1 %v2273_v10  ;;  %2581 = vmatpush3.bf16.msra.mxu0 %v2859_v14  ;;  %v2917_v10 = vld [vmem:[%s3717_s1 + $0x370] sm:$0xff]   ;;  %v2921_v14 = vld [vmem:[%s3717_s1 + $0x378] sm:$0xff]  }
  0x45   :  { %2603 = vmatpush3.bf16.msra.mxu1 %v2860_v15  ;;  %2582 = vmatprep.subr.bf16.mxu0 %v2861_v16  ;;  %v2922_v15 = vld [vmem:[%s3717_s1 + $0x3f8] sm:$0xff]  }
  0x46   :  { %2604 = vmatprep.subr.bf16.mxu1 %v2862_v17  ;;  %1853 = vmatprep.mubr.bf16.mxu0 %v2276_v47  ;;  %v2923_v16 = vld [vmem:[%s3717_s1 + $0x338] sm:$0xff]   ;;  %v2952_v47 = vld [vmem:[%s3717_s1 + $0x4a8] sm:$0xff]  }
  0x47   :  { %1893 = vmatprep.mubr.bf16.mxu1 %v2278_v49  ;;  %v2924_v17 = vld [vmem:[%s3717_s1 + $0x3b8] sm:$0xff]   ;;  %v2954_v49 = vld [vmem:[%s3717_s1 + $0x4f0] sm:$0xff]  }
  0x48   :  { %2583 = vmatpush3.bf16.msra.mxu0 %v2863_v18  ;;  %v28_v18 = vld [vmem:[%s3716_s0 + $0x30] sm:$0xff] }
  0x49   :  { %2605 = vmatpush3.bf16.msra.mxu1 %v2864_v19  ;;  %2584 = vmatprep.subr.bf16.mxu0 %v2865_v20  ;;  %v29_v19 = vld [vmem:[%s3716_s0 + $0x38] sm:$0xff]  ;;  %v2279_v20 = vcombine.low %v28_v18, %v28_v18 }
  0x4a   :  { %2606 = vmatprep.subr.bf16.mxu1 %v2866_v21  ;;  %v2280_v21 = vcombine.high %v28_v18, %v28_v18  ;;  %v2985_v18 = vld [vmem:[%s3717_s1 + $0x568] sm:$0xff]  }
  0x4c   :  { %2585 = vmatpush3.bf16.msra.mxu0 %v2867_v22  ;;  %v2281_v22 = vcombine.low %v29_v19, %v29_v19 }
  0x4d   :  { %2607 = vmatpush3.bf16.msra.mxu1 %v2868_v23  ;;  %2586 = vmatprep.subr.bf16.mxu0 %v2869_v24  ;;  %v2929_v23 = vld [vmem:[%s3717_s1 + $0x440] sm:$0xff]   ;;  %v2282_v24 = vcombine.high %v29_v19, %v29_v19  ;;  %v2986_v19 = vld [vmem:[%s3717_s1 + $0x5e8] sm:$0xff]  }
  0x4e   :  { %2608 = vmatprep.subr.bf16.mxu1 %v2870_v25  ;;  %v2930_v25 = vld [vmem:[%s3717_s1 + $0x4c0] sm:$0xff]  }
  0x50   :  { %2587 = vmatpush3.bf16.msra.mxu0 %v2871_v26  ;;  %v2931_v26 = vld [vmem:[%s3717_s1 + $0x400] sm:$0xff]  }
  0x51   :  { %2609 = vmatpush3.bf16.msra.mxu1 %v2872_v27  ;;  %2588 = vmatprep.subr.bf16.mxu0 %v2873_v28  ;;  %v2932_v27 = vld [vmem:[%s3717_s1 + $0x480] sm:$0xff]   ;;  %v2933_v28 = vld [vmem:[%s3717_s1 + $0x448] sm:$0xff]  }
  0x52   :  { %2610 = vmatprep.subr.bf16.mxu1 %v2874_v29  ;;  %v2934_v29 = vld [vmem:[%s3717_s1 + $0x4c8] sm:$0xff]  }
  0x54   :  { %2589 = vmatpush3.bf16.msra.mxu0 %v2875_v30  ;;  %v2935_v30 = vld [vmem:[%s3717_s1 + $0x408] sm:$0xff]  }
  0x55   :  { %2611 = vmatpush3.bf16.msra.mxu1 %v2876_v31  ;;  %2590 = vmatprep.subr.bf16.mxu0 %v2877_v32  ;;  %v2936_v31 = vld [vmem:[%s3717_s1 + $0x488] sm:$0xff]   ;;  %v2937_v32 = vld [vmem:[%s3717_s1 + $0x450] sm:$0xff]  }
  0x56   :  { %2612 = vmatprep.subr.bf16.mxu1 %v2878_v33  ;;  %v2938_v33 = vld [vmem:[%s3717_s1 + $0x4d0] sm:$0xff]  }
  0x58   :  { %2591 = vmatpush3.bf16.msra.mxu0 %v2879_v34  ;;  %v2939_v34 = vld [vmem:[%s3717_s1 + $0x410] sm:$0xff]  }
  0x59   :  { %2613 = vmatpush3.bf16.msra.mxu1 %v2880_v35  ;;  %2592 = vmatprep.subr.bf16.mxu0 %v2881_v36  ;;  %v2940_v35 = vld [vmem:[%s3717_s1 + $0x490] sm:$0xff]   ;;  %v2941_v36 = vld [vmem:[%s3717_s1 + $0x458] sm:$0xff]  }
  0x5a   :  { %2614 = vmatprep.subr.bf16.mxu1 %v2882_v37  ;;  %v2942_v37 = vld [vmem:[%s3717_s1 + $0x4d8] sm:$0xff]  }
  0x5c   :  { %2593 = vmatpush3.bf16.msra.mxu0 %v2883_v38  ;;  %v2943_v38 = vld [vmem:[%s3717_s1 + $0x418] sm:$0xff]  }
  0x5d   :  { %2615 = vmatpush3.bf16.msra.mxu1 %v2884_v39  ;;  %2594 = vmatprep.subr.bf16.mxu0 %v2885_v40  ;;  %v2944_v39 = vld [vmem:[%s3717_s1 + $0x498] sm:$0xff]   ;;  %v2945_v40 = vld [vmem:[%s3717_s1 + $0x460] sm:$0xff]  }
  0x5e   :  { %2616 = vmatprep.subr.bf16.mxu1 %v2886_v41  ;;  %v2946_v41 = vld [vmem:[%s3717_s1 + $0x4e0] sm:$0xff]  }
  0x60   :  { %2595 = vmatpush3.bf16.msra.mxu0 %v2887_v42  ;;  %v2947_v42 = vld [vmem:[%s3717_s1 + $0x420] sm:$0xff]  }
  0x61   :  { %2617 = vmatpush3.bf16.msra.mxu1 %v2888_v43  ;;  %2624 = vmatprep.subr.bf16.mxu0 %v2893_v50  ;;  %v2948_v43 = vld [vmem:[%s3717_s1 + $0x4a0] sm:$0xff]   ;;  %v2955_v50 = vld [vmem:[%s3717_s1 + $0x430] sm:$0xff]  }
  0x62   :  { %2646 = vmatprep.subr.bf16.mxu1 %v2894_v51  ;;  %v2956_v51 = vld [vmem:[%s3717_s1 + $0x4b0] sm:$0xff]  }
  0x63   :  { %1854 = vmatmul.mubr.bf16.vlgmr.msra.gmra.mrb[8].mxu0 %v2275_v46  ;;  %v2951_v46 = vld [vmem:[%s3717_s1 + $0x428] sm:$0xff]  }
  0x64   :  { %1894 = vmatmul.mubr.bf16.vlgmr.msra.gmra.mrb[8].mxu1 %v2277_v48  ;;  %2625 = vmatpush3.bf16.msra.mxu0 %v2895_v52  ;;  %v2953_v48 = vld [vmem:[%s3717_s1 + $0x470] sm:$0xff]   ;;  %v2957_v52 = vld [vmem:[%s3717_s1 + $0x478] sm:$0xff]  }
  0x65   :  { %2647 = vmatpush3.bf16.msra.mxu1 %v2896_v53  ;;  %2626 = vmatprep.subr.bf16.mxu0 %v2897_v54  ;;  %v2958_v53 = vld [vmem:[%s3717_s1 + $0x4f8] sm:$0xff]  }
  0x66   :  { %2648 = vmatprep.subr.bf16.mxu1 %v2898_v55  ;;  %1933 = vmatprep.mubr.bf16.mxu0 %v2280_v21  ;;  %v2959_v54 = vld [vmem:[%s3717_s1 + $0x438] sm:$0xff]   ;;  %v2988_v21 = vld [vmem:[%s3717_s1 + $0x5a8] sm:$0xff]  }
  0x67   :  { %1973 = vmatprep.mubr.bf16.mxu1 %v2282_v24  ;;  %v2960_v55 = vld [vmem:[%s3717_s1 + $0x4b8] sm:$0xff]   ;;  %v2991_v24 = vld [vmem:[%s3717_s1 + $0x530] sm:$0xff]  }
  0x68   :  { %2627 = vmatpush3.bf16.msra.mxu0 %v2899_v56  ;;  %v30_v56 = vld [vmem:[%s3716_s0 + $0x40] sm:$0xff] }
  0x69   :  { %2649 = vmatpush3.bf16.msra.mxu1 %v2900_v57  ;;  %2628 = vmatprep.subr.bf16.mxu0 %v2901_v58  ;;  %v2283_v57 = vcombine.low %v30_v56, %v30_v56  ;;  %v2284_v58 = vcombine.high %v30_v56, %v30_v56 }
  0x6a   :  { %2650 = vmatprep.subr.bf16.mxu1 %v2902_v59  ;;  %v31_v59 = vld [vmem:[%s3716_s0 + $0x48] sm:$0xff] }
  0x6c   :  { %2629 = vmatpush3.bf16.msra.mxu0 %v2903_v60  ;;  %v2285_v60 = vcombine.low %v31_v59, %v31_v59 }
  0x6d   :  { %2651 = vmatpush3.bf16.msra.mxu1 %v2904_v61  ;;  %2630 = vmatprep.subr.bf16.mxu0 %v2905_v62  ;;  %v2286_v61 = vcombine.high %v31_v59, %v31_v59  ;;  %v2965_v62 = vld [vmem:[%s3717_s1 + $0x540] sm:$0xff]  }
  0x6e   :  { %2652 = vmatprep.subr.bf16.mxu1 %v2906_v63  ;;  %v2966_v63 = vld [vmem:[%s3717_s1 + $0x5c0] sm:$0xff]  }
  0x70   :  { %2631 = vmatpush3.bf16.msra.mxu0 %v2907_v0  ;;  %v2967_v0 = vld [vmem:[%s3717_s1 + $0x500] sm:$0xff]  }
  0x71   :  { %2653 = vmatpush3.bf16.msra.mxu1 %v2908_v1  ;;  %2632 = vmatprep.subr.bf16.mxu0 %v2909_v2  ;;  %v2968_v1 = vld [vmem:[%s3717_s1 + $0x580] sm:$0xff]   ;;  %v2969_v2 = vld [vmem:[%s3717_s1 + $0x548] sm:$0xff]  }
  0x72   :  { %2654 = vmatprep.subr.bf16.mxu1 %v2910_v3  ;;  %v2970_v3 = vld [vmem:[%s3717_s1 + $0x5c8] sm:$0xff]  }
  0x74   :  { %2633 = vmatpush3.bf16.msra.mxu0 %v2911_v4  ;;  %v2971_v4 = vld [vmem:[%s3717_s1 + $0x508] sm:$0xff]  }
  0x75   :  { %2655 = vmatpush3.bf16.msra.mxu1 %v2912_v5  ;;  %2634 = vmatprep.subr.bf16.mxu0 %v2913_v6  ;;  %v2972_v5 = vld [vmem:[%s3717_s1 + $0x588] sm:$0xff]   ;;  %v2973_v6 = vld [vmem:[%s3717_s1 + $0x550] sm:$0xff]  }
  0x76   :  { %2656 = vmatprep.subr.bf16.mxu1 %v2914_v7  ;;  %v2974_v7 = vld [vmem:[%s3717_s1 + $0x5d0] sm:$0xff]  }
  0x78   :  { %2635 = vmatpush3.bf16.msra.mxu0 %v2915_v8  ;;  %v2975_v8 = vld [vmem:[%s3717_s1 + $0x510] sm:$0xff]  }
  0x79   :  { %2657 = vmatpush3.bf16.msra.mxu1 %v2916_v9  ;;  %2636 = vmatprep.subr.bf16.mxu0 %v2917_v10  ;;  %v2976_v9 = vld [vmem:[%s3717_s1 + $0x590] sm:$0xff]   ;;  %v2977_v10 = vld [vmem:[%s3717_s1 + $0x558] sm:$0xff]  }
  0x7a   :  { %2658 = vmatprep.subr.bf16.mxu1 %v2918_v11  ;;  %v2978_v11 = vld [vmem:[%s3717_s1 + $0x5d8] sm:$0xff]  }
  0x7c   :  { %2637 = vmatpush3.bf16.msra.mxu0 %v2919_v12  ;;  %v2979_v12 = vld [vmem:[%s3717_s1 + $0x518] sm:$0xff]  }
  0x7d   :  { %2659 = vmatpush3.bf16.msra.mxu1 %v2920_v13  ;;  %2638 = vmatprep.subr.bf16.mxu0 %v2921_v14  ;;  %v2980_v13 = vld [vmem:[%s3717_s1 + $0x598] sm:$0xff]   ;;  %v2981_v14 = vld [vmem:[%s3717_s1 + $0x560] sm:$0xff]  }
  0x7e   :  { %2660 = vmatprep.subr.bf16.mxu1 %v2922_v15  ;;  %v2982_v15 = vld [vmem:[%s3717_s1 + $0x5e0] sm:$0xff]  }
  0x80   :  { %2639 = vmatpush3.bf16.msra.mxu0 %v2923_v16  ;;  %v2983_v16 = vld [vmem:[%s3717_s1 + $0x520] sm:$0xff]  }
  0x81   :  { %2661 = vmatpush3.bf16.msra.mxu1 %v2924_v17  ;;  %2668 = vmatprep.subr.bf16.mxu0 %v2929_v23  ;;  %v2984_v17 = vld [vmem:[%s3717_s1 + $0x5a0] sm:$0xff]   ;;  %v2990_v23 = vld [vmem:[%s3717_s1 + $0x5f0] sm:$0xff]  }
  0x82   :  { %2690 = vmatprep.subr.bf16.mxu1 %v2930_v25  ;;  %v2992_v25 = vld [vmem:[%s3717_s1 + $0x5b0] sm:$0xff]  }
  0x83   :  { %1934 = vmatmul.mubr.bf16.vlgmr.msra.gmra.mrb[12].mxu0 %v2279_v20  ;;  %v2987_v20 = vld [vmem:[%s3717_s1 + $0x528] sm:$0xff]  }
  0x84   :  { %1974 = vmatmul.mubr.bf16.vlgmr.msra.gmra.mrb[12].mxu1 %v2281_v22  ;;  %2669 = vmatpush3.bf16.msra.mxu0 %v2931_v26  ;;  %v2989_v22 = vld [vmem:[%s3717_s1 + $0x570] sm:$0xff]   ;;  %v2993_v26 = vld [vmem:[%s3717_s1 + $0x578] sm:$0xff]  }
  0x85   :  { %2691 = vmatpush3.bf16.msra.mxu1 %v2932_v27  ;;  %2670 = vmatprep.subr.bf16.mxu0 %v2933_v28  ;;  %v2994_v27 = vld [vmem:[%s3717_s1 + $0x5f8] sm:$0xff]  }
  0x86   :  { %2692 = vmatprep.subr.bf16.mxu1 %v2934_v29  ;;  %2013 = vmatprep.mubr.bf16.mxu0 %v2284_v58  ;;  %v2995_v28 = vld [vmem:[%s3717_s1 + $0x538] sm:$0xff]  }
  0x87   :  { %2053 = vmatprep.mubr.bf16.mxu1 %v2286_v61  ;;  %v2996_v29 = vld [vmem:[%s3717_s1 + $0x5b8] sm:$0xff]  }
  0x88   :  { %2671 = vmatpush3.bf16.msra.mxu0 %v2935_v30  ;;  %v32_v30 = vld [vmem:[%s3716_s0 + $0x50] sm:$0xff] }
  0x89   :  { %2693 = vmatpush3.bf16.msra.mxu1 %v2936_v31  ;;  %2672 = vmatprep.subr.bf16.mxu0 %v2937_v32  ;;  %v33_v31 = vld [vmem:[%s3716_s0 + $0x58] sm:$0xff]  ;;  %v2287_v32 = vcombine.low %v32_v30, %v32_v30 }
  0x8a   :  { %2694 = vmatprep.subr.bf16.mxu1 %v2938_v33  ;;  %v2288_v33 = vcombine.high %v32_v30, %v32_v30 }
  0x8c   :  { %2673 = vmatpush3.bf16.msra.mxu0 %v2939_v34  ;;  %v2289_v34 = vcombine.low %v33_v31, %v33_v31 }
  0x8d   :  { %2695 = vmatpush3.bf16.msra.mxu1 %v2940_v35  ;;  %2674 = vmatprep.subr.bf16.mxu0 %v2941_v36  ;;  %v2290_v35 = vcombine.high %v33_v31, %v33_v31 }
  0x8e   :  { %2696 = vmatprep.subr.bf16.mxu1 %v2942_v37 }
  0x90   :  { %2675 = vmatpush3.bf16.msra.mxu0 %v2943_v38 }
  0x91   :  { %2697 = vmatpush3.bf16.msra.mxu1 %v2944_v39  ;;  %2676 = vmatprep.subr.bf16.mxu0 %v2945_v40 }
  0x92   :  { %2698 = vmatprep.subr.bf16.mxu1 %v2946_v41 }
  0x94   :  { %2677 = vmatpush3.bf16.msra.mxu0 %v2947_v42 }
  0x95   :  { %2699 = vmatpush3.bf16.msra.mxu1 %v2948_v43  ;;  %2678 = vmatprep.subr.bf16.mxu0 %v2949_v44 }
  0x96   :  { %2700 = vmatprep.subr.bf16.mxu1 %v2950_v45 }
  0x98   :  { %2679 = vmatpush3.bf16.msra.mxu0 %v2951_v46 }
  0x99   :  { %2701 = vmatpush3.bf16.msra.mxu1 %v2952_v47  ;;  %2680 = vmatprep.subr.bf16.mxu0 %v2953_v48 }
  0x9a   :  { %2702 = vmatprep.subr.bf16.mxu1 %v2954_v49 }
  0x9c   :  { %2681 = vmatpush3.bf16.msra.mxu0 %v2955_v50 }
  0x9d   :  { %2703 = vmatpush3.bf16.msra.mxu1 %v2956_v51  ;;  %2682 = vmatprep.subr.bf16.mxu0 %v2957_v52 }
  0x9e   :  { %2704 = vmatprep.subr.bf16.mxu1 %v2958_v53 }
  0xa0   :  { %2683 = vmatpush3.bf16.msra.mxu0 %v2959_v54 }
  0xa1   :  { %2705 = vmatpush3.bf16.msra.mxu1 %v2960_v55  ;;  %2712 = vmatprep.subr.bf16.mxu0 %v2965_v62 }
  0xa2   :  { %2734 = vmatprep.subr.bf16.mxu1 %v2966_v63 }
  0xa3   :  { %2014 = vmatmul.mubr.bf16.vlgmr.msra.gmra.mrb[16].mxu0 %v2283_v57 }
  0xa4   :  { %2054 = vmatmul.mubr.bf16.vlgmr.msra.gmra.mrb[16].mxu1 %v2285_v60  ;;  %2713 = vmatpush3.bf16.msra.mxu0 %v2967_v0 }
  0xa5   :  { %2735 = vmatpush3.bf16.msra.mxu1 %v2968_v1  ;;  %2714 = vmatprep.subr.bf16.mxu0 %v2969_v2 }
  0xa6   :  { %2736 = vmatprep.subr.bf16.mxu1 %v2970_v3  ;;  %2093 = vmatprep.mubr.bf16.mxu0 %v2288_v33 }
  0xa7   :  { %2133 = vmatprep.mubr.bf16.mxu1 %v2290_v35 }
  0xa8   :  { %2715 = vmatpush3.bf16.msra.mxu0 %v2971_v4 }
  0xa9   :  { %2737 = vmatpush3.bf16.msra.mxu1 %v2972_v5  ;;  %2716 = vmatprep.subr.bf16.mxu0 %v2973_v6 }
  0xaa   :  { %2738 = vmatprep.subr.bf16.mxu1 %v2974_v7 }
  0xac   :  { %2717 = vmatpush3.bf16.msra.mxu0 %v2975_v8 }
  0xad   :  { %2739 = vmatpush3.bf16.msra.mxu1 %v2976_v9  ;;  %2718 = vmatprep.subr.bf16.mxu0 %v2977_v10 }
  0xae   :  { %2740 = vmatprep.subr.bf16.mxu1 %v2978_v11 }
  0xb0   :  { %2719 = vmatpush3.bf16.msra.mxu0 %v2979_v12 }
  0xb1   :  { %2741 = vmatpush3.bf16.msra.mxu1 %v2980_v13  ;;  %2720 = vmatprep.subr.bf16.mxu0 %v2981_v14 }
  0xb2   :  { %2742 = vmatprep.subr.bf16.mxu1 %v2982_v15 }
  0xb4   :  { %2721 = vmatpush3.bf16.msra.mxu0 %v2983_v16 }
  0xb5   :  { %2743 = vmatpush3.bf16.msra.mxu1 %v2984_v17  ;;  %2722 = vmatprep.subr.bf16.mxu0 %v2985_v18 }
  0xb6   :  { %2744 = vmatprep.subr.bf16.mxu1 %v2986_v19 }
  0xb8   :  { %2723 = vmatpush3.bf16.msra.mxu0 %v2987_v20 }
  0xb9   :  { %2745 = vmatpush3.bf16.msra.mxu1 %v2988_v21  ;;  %2724 = vmatprep.subr.bf16.mxu0 %v2989_v22 }
  0xba   :  { %2746 = vmatprep.subr.bf16.mxu1 %v2990_v23 }
  0xbc   :  { %2725 = vmatpush3.bf16.msra.mxu0 %v2991_v24 }
  0xbd   :  { %2747 = vmatpush3.bf16.msra.mxu1 %v2992_v25  ;;  %2726 = vmatprep.subr.bf16.mxu0 %v2993_v26 }
  0xbe   :  { %2748 = vmatprep.subr.bf16.mxu1 %v2994_v27 }
  0xc0   :  { %2727 = vmatpush3.bf16.msra.mxu0 %v2995_v28 }
  0xc1   :  { %2749 = vmatpush3.bf16.msra.mxu1 %v2996_v29 }
  0xc3   :  { %2094 = vmatmul.mubr.bf16.vlgmr.msra.gmra.mrb[20].mxu0 %v2287_v32 }
  0xc4   :  { %2134 = vmatmul.mubr.bf16.vlgmr.msra.gmra.mrb[20].mxu1 %v2289_v34 }
  0xc5   :  { %10 = vsyncpa [#allocation3], 0  ;;  %v2266_v38 = vld [vmem:[%s3718_s2] ss:$0 sm:$0xff]  ;;  %v3032_v50 = vmov 0.0   ;;  %v3002_v51 = vld [vmem:[%s3719_s3 + $0x8] sm:$0xff]  }
  0xc6   :  { %v3001_v49 = vld [vmem:[%s3719_s3] sm:$0xff]   ;;  %2764 = vmatprep.subr.bf16.mxu0 %v3032_v50  ;;  %v3003_v52 = vld [vmem:[%s3719_s3 + $0x10] sm:$0xff]   ;;  %v3004_v53 = vld [vmem:[%s3719_s3 + $0x18] sm:$0xff]   ;;  %vm2206_vm0 = vcmask 1041408   ;;  %vm3033_vm1 = vmmov 0   ;;  %vm2202_vm2 = vcmask 818176  }
  0xc7   :  { %2765 = vmatpush3.bf16.msra.mxu0 %v3001_v49  ;;  %v3005_v62 = vld [vmem:[%s3719_s3 + $0x20] sm:$0xff]   ;;  %v3006_v3 = vld [vmem:[%s3719_s3 + $0x28] sm:$0xff]   ;;  %v3007_v4 = vld [vmem:[%s3719_s3 + $0x30] ss:$0 sps:$4 sm:$0x33]   ;;  %2778 = vmatprep.mubr.msk.bf16.mxu0 %vm3033_vm1, %v3032_v50  ;;  %s3034_s15 = smov [#allocation2]  }
  0xc8   :  { %2766 = vmatprep.subr.bf16.mxu0 %v3032_v50  ;;  %v2208_v5 = vsel %vm2206_vm0, %v3007_v4, 0  ;;  %s2258_s16 = sshll.u32 %s3034_s15, 4  ;;  %vm2250_vm3 = vcmask 80896   ;;  %s2259_s16 = int_to_ptr.vmem [resolvable:$true] %s2258_s16 }
  0xc9   :  { %s3008_s17 = scalar_lea.vmem %s2259_s16, 128  ;;  %p3013_p1 = scmp.lt.s32.totalorder %s2259_s16, %s2259_s16 }
  0xca   :  { %p3009_p0 = scmp.ne.s32.totalorder %s2259_s16, %s3008_s17  ;;  %p3014_p2 = scmp.lt.s32.totalorder %s3008_s17, %s3008_s17 }
  0xcb   :  { %2767 = vmatpush3.bf16.msra.mxu0 %v3002_v51 }
  0xcc   :  { %2768 = vmatprep.subr.bf16.mxu0 %v3032_v50  ;;  %p3015_p3 = por %p3014_p2, %p3013_p1 }
  0xce   :  { %p3016_p4 = pnand %p3015_p3, %p3009_p0 }
  0xcf   :  { %2769 = vmatpush3.bf16.msra.mxu0 %v3003_v52 }
  0xd0   :  { %2770 = vmatprep.subr.bf16.mxu0 %v3032_v50 }
  0xd3   :  { %2771 = vmatpush3.bf16.msra.mxu0 %v3004_v53 }
  0xd4   :  { %2772 = vmatprep.subr.bf16.mxu0 %v3032_v50 }
  0xd7   :  { %2773 = vmatpush3.bf16.msra.mxu0 %v3005_v62 }
  0xd8   :  { %2774 = vmatprep.subr.bf16.mxu0 %v3032_v50 }
  0xdb   :  { %2775 = vmatpush3.bf16.msra.mxu0 %v3006_v3 }
  0xdc   :  { %2776 = vmatprep.subr.bf16.mxu0 %v3032_v50 }
  0xdf   :  { %2777 = vmatpush3.bf16.msra.mxu0 %v2208_v5 }
  0xf6   :  { %v2508_v36 = vpop.f32.mrb[0].mxu0 }
  0xf7   :  { %v2530_v37 = vpop.f32.mrb[0].mxu1  ;;  %v2509_v39 = vpop.f32.mrb[1].mxu0 }
  0xf8   :  { %v2531_v40 = vpop.f32.mrb[1].mxu1  ;;  %v2510_v41 = vadd.f32 %v2509_v39, %v2508_v36  ;;  %v2511_v43 = vpop.f32.mrb[2].mxu0 }
  0xf9   :  { %v2532_v42 = vadd.f32 %v2531_v40, %v2530_v37  ;;  %v2533_v44 = vpop.f32.mrb[2].mxu1  ;;  %v2512_v45 = vpop.f32.mrb[3].mxu0 }
  0xfa   :  { %v2534_v46 = vpop.f32.mrb[3].mxu1  ;;  %v1696_v47 = vadd.f32 %v2510_v41, %v2266_v38 }
  0xfc   :  { %v1736_v48 = vadd.f32 %v2532_v42, %v1696_v47 }
 0x116   :  { %v2552_v54 = vpop.f32.mrb[4].mxu0 }
 0x117   :  { %v2574_v55 = vpop.f32.mrb[4].mxu1  ;;  %v2553_v56 = vpop.f32.mrb[5].mxu0 }
 0x118   :  { %v2575_v57 = vpop.f32.mrb[5].mxu1  ;;  %v2554_v58 = vadd.f32 %v2553_v56, %v2552_v54  ;;  %v2555_v60 = vpop.f32.mrb[6].mxu0  ;;  %v2483_v56 = vld [vmem:[%s3720_s4] ss:$0 sm:$0xff] }
 0x119   :  { %v2576_v59 = vadd.f32 %v2575_v57, %v2574_v55  ;;  %v2577_v61 = vpop.f32.mrb[6].mxu1  ;;  %v2556_v63 = vpop.f32.mrb[7].mxu0 }
 0x11a   :  { %v2578_v0 = vpop.f32.mrb[7].mxu1  ;;  %v1776_v1 = vadd.f32 %v2554_v58, %v1736_v48 }
 0x11c   :  { %v1816_v2 = vadd.f32 %v2576_v59, %v1776_v1 }
 0x136   :  { %v2596_v6 = vpop.f32.mrb[8].mxu0 }
 0x137   :  { %v2618_v7 = vpop.f32.mrb[8].mxu1  ;;  %v2597_v8 = vpop.f32.mrb[9].mxu0 }
 0x138   :  { %v2598_v9 = vadd.f32 %v2597_v8, %v2596_v6  ;;  %v2619_v10 = vpop.f32.mrb[9].mxu1  ;;  %v2599_v11 = vpop.f32.mrb[10].mxu0 }
 0x139   :  { %v2620_v12 = vadd.f32 %v2619_v10, %v2618_v7  ;;  %v2621_v13 = vpop.f32.mrb[10].mxu1  ;;  %v2600_v14 = vpop.f32.mrb[11].mxu0 }
 0x13a   :  { %v1856_v15 = vadd.f32 %v2598_v9, %v1816_v2  ;;  %v2622_v16 = vpop.f32.mrb[11].mxu1 }
 0x13c   :  { %v1896_v17 = vadd.f32 %v2620_v12, %v1856_v15 }
 0x156   :  { %v2640_v18 = vpop.f32.mrb[12].mxu0 }
 0x157   :  { %v2662_v19 = vpop.f32.mrb[12].mxu1  ;;  %v2641_v20 = vpop.f32.mrb[13].mxu0 }
 0x158   :  { %v2642_v21 = vadd.f32 %v2641_v20, %v2640_v18  ;;  %v2663_v22 = vpop.f32.mrb[13].mxu1  ;;  %v2643_v23 = vpop.f32.mrb[14].mxu0 }
 0x159   :  { %v2664_v24 = vadd.f32 %v2663_v22, %v2662_v19  ;;  %v2665_v25 = vpop.f32.mrb[14].mxu1  ;;  %v2644_v26 = vpop.f32.mrb[15].mxu0 }
 0x15a   :  { %v1936_v27 = vadd.f32 %v2642_v21, %v1896_v17  ;;  %v2666_v28 = vpop.f32.mrb[15].mxu1 }
 0x15c   :  { %v1976_v29 = vadd.f32 %v2664_v24, %v1936_v27 }
 0x176   :  { %v2684_v30 = vpop.f32.mrb[16].mxu0 }
 0x177   :  { %v2706_v31 = vpop.f32.mrb[16].mxu1  ;;  %v2685_v32 = vpop.f32.mrb[17].mxu0 }
 0x178   :  { %v2707_v33 = vpop.f32.mrb[17].mxu1  ;;  %v2686_v34 = vadd.f32 %v2685_v32, %v2684_v30  ;;  %v2687_v36 = vpop.f32.mrb[18].mxu0 }
 0x179   :  { %v2708_v35 = vadd.f32 %v2707_v33, %v2706_v31  ;;  %v2709_v37 = vpop.f32.mrb[18].mxu1  ;;  %v2688_v38 = vpop.f32.mrb[19].mxu0 }
 0x17a   :  { %v2710_v39 = vpop.f32.mrb[19].mxu1  ;;  %v2016_v40 = vadd.f32 %v2686_v34, %v1976_v29 }
 0x17c   :  { %v2056_v41 = vadd.f32 %v2708_v35, %v2016_v40 }
 0x196   :  { %v2728_v42 = vpop.f32.mrb[20].mxu0 }
 0x197   :  { %v2750_v43 = vpop.f32.mrb[20].mxu1  ;;  %v2729_v44 = vpop.f32.mrb[21].mxu0 }
 0x198   :  { %v2730_v45 = vadd.f32 %v2729_v44, %v2728_v42  ;;  %v2751_v46 = vpop.f32.mrb[21].mxu1  ;;  %v2731_v47 = vpop.f32.mrb[22].mxu0 }
 0x199   :  { %v2752_v48 = vadd.f32 %v2751_v46, %v2750_v43  ;;  %v2753_v49 = vpop.f32.mrb[22].mxu1  ;;  %v2732_v50 = vpop.f32.mrb[23].mxu0 }
 0x19a   :  { %v2096_v51 = vadd.f32 %v2730_v45, %v2056_v41  ;;  %v2754_v52 = vpop.f32.mrb[23].mxu1 }
 0x19c   :  { %v2136_v53 = vadd.f32 %v2752_v48, %v2096_v51 }
 0x19e   :  { %v2141_v54 = vmax.f32 %v2136_v53, 0.0 }
 0x1a0   :  { %v2142_v55 = vpack.c.bf16 %v2141_v54, %v2141_v54 }
 0x1a2   :  { %2779 = vmatmul.mubr.msk.bf16.vlgmr.msra.gmra.mrb[24].mxu0 %vm2202_vm2, %v2142_v55 }
 0x275   :  { %v2244_v57 = vpop.f32.mrb[24].mxu0 }
 0x276   :  { %v2245_v58 = vadd.f32 %v2483_v56, %v2244_v57  ;;  %v2780_v59 = vpop.f32.mrb[25].mxu0 }
 0x277   :  { %v2247_v60 = vpop.f32.mrb[26].mxu0 }
 0x278   :  { %v2781_v61 = vpop.f32.mrb[27].mxu0  ;;  %2251 = vst.msk [vmem:[#allocation2] sm:$0xff] %vm2250_vm3, %v2245_v58 }
 0x279   :  { %3019 = shalt.err (!%p3016_p4)
}
 0x27a   :  { %s3020_s4 = scalar_lea.hbm %s3721_s5, 128 }
 0x27b   :  { %p3021_p5 = scmp.ne.s32.totalorder %s3721_s5, %s3020_s4  ;;  %p3024_p6 = scmp.lt.u32.totalorder %s3020_s4, %s3721_s5 }
 0x27d   :  { %p3026_p7 = pnand %p3024_p6, %p3021_p5 }
 0x27f   :  { %3029 = shalt.err (!%p3026_p7)
}
 0x280   :  { %2261 = dma.vmem_to_hbm [thread:$0]  %s2259_s16, 128, %s3721_s5, [#allocation3]  }
 0x281   :  { %3030 = dma.done.wait [#allocation3], 128  }
 0x282   :  { %3031 = vsyncadd [#allocation3], 4294967168 }
 0x283   :  { %2265 = vsyncpa [#allocation3], 1 }

</bundles_post_ra>
